<compile_context>
chip_gen: v5e
topology: v5e:2x2
jax: 0.10.0
libtpu: 0.0.40
codegen_flags: <defaults>
</compile_context>

<pallas_src>
import jax
import jax.numpy as jnp
from jax.experimental import pallas as pl
from jax.experimental.pallas import tpu as pltpu

# Per-pipeline-buffer budgets (double-buffering doubles these at runtime).
_IN_BLOCK_BUDGET = 4 * 1024 * 1024      # cap on one table (row_tile, D) block
_TOTAL_BLOCK_BUDGET = 20 * 1024 * 1024  # cap on (table block + output block)
_VMEM_LIMIT_BYTES = 48 * 1024 * 1024    # < 64 MiB physical on v7x


def _pos_embed_kernel(table_ref, out_ref):
    # table_ref: (row_tile, d_model)         — table rows for seq tile i
    # out_ref  : (b_tile, row_tile, d_model) — output block for (seq tile i, batch tile b)
    # The batch broadcast happens here; because the table block index does not
    # change across the inner batch-tile grid axis, the rows are DMA'd from
    # HBM only once per seq tile.
    out_ref[...] = jnp.broadcast_to(table_ref[...][None, :, :], out_ref.shape)


def _round_up(x, m):
    return ((x + m - 1) // m) * m


def _choose_tiles(batch, seq_len, d_model, itemsize, max_len):
    """Pick (row_tile, b_tile) so blocks are large but fit the VMEM budget."""
    # Native sublane packing per dtype width (f32: 8, bf16: 16, int8/fp8: 32).
    sublane = {4: 8, 2: 16, 1: 32}.get(itemsize, 8)
    row_bytes = d_model * itemsize

    # Table block: as many rows as we want to cover of the sequence per step,
    # capped so it leaves most of the budget to the (batched) output block and
    # capped to the table's own sublane-aligned extent.
    max_in_rows = max(sublane, (_IN_BLOCK_BUDGET // max(row_bytes, 1)) // sublane * sublane)
    max_table_rows = max(sublane, (max_len // sublane) * sublane)
    row_tile = min(_round_up(seq_len, sublane), max_in_rows, max_table_rows)

    in_block = row_tile * row_bytes
    out_budget = _TOTAL_BLOCK_BUDGET - in_block
    b_tile = max(1, min(batch, out_budget // max(in_block, 1)))
    return row_tile, b_tile


def position_embedding(table, batch, seq_len):
    """Pallas implementation of Position_Embedding.forward.

    table:   (max_len, d_model) embedding weights (nn.Embedding.weight)
    returns: (batch, seq_len, d_model) == table[arange(seq_len)] broadcast over batch
    """
    max_len, d_model = table.shape
    assert seq_len <= max_len, "sequence length exceeds max_len of the embedding"
    itemsize = jnp.dtype(table.dtype).itemsize

    row_tile, b_tile = _choose_tiles(batch, seq_len, d_model, itemsize, max_len)
    n_seq = pl.cdiv(seq_len, row_tile)
    n_bat = pl.cdiv(batch, b_tile)

    # Pure-DMA kernel: flops = 0; bytes = one table read + full output write.
    cost = pl.CostEstimate(
        flops=0,
        transcendentals=0,
        bytes_accessed=seq_len * d_model * itemsize
        + batch * seq_len * d_model * itemsize,
    )

    return pl.pallas_call(
        _pos_embed_kernel,
        out_shape=jax.ShapeDtypeStruct((batch, seq_len, d_model), table.dtype),
        # Batch-tile axis innermost: the table block index (i, 0) is constant
        # across it, so the table tile is not re-fetched between batch steps.
        grid=(n_seq, n_bat),
        in_specs=[
            pl.BlockSpec((row_tile, d_model), lambda i, b: (i, 0)),
        ],
        out_specs=pl.BlockSpec(
            (b_tile, row_tile, d_model), lambda i, b: (b, i, 0)
        ),
        compiler_params=pltpu.CompilerParams(
            dimension_semantics=("parallel", "parallel"),
            vmem_limit_bytes=_VMEM_LIMIT_BYTES,
        ),
        cost_estimate=cost,
    )(table)


if __name__ == "__main__":
    # Module hyper-params (TPU-tile friendly, matching Position_Embedding).
    d_model = 128
    max_len = 512

    # forward() only uses x.shape[0] and x.shape[1].
    batch, seq_len = 2, 8
    key = jax.random.PRNGKey(0)
    k_x, k_w = jax.random.split(key)
    x = jax.random.normal(k_x, (batch, seq_len, d_model), dtype=jnp.float32)

    # Deterministic nn.Embedding-style weight (N(0, 1), PyTorch default init).
    emb_table = jax.random.normal(k_w, (max_len, d_model), dtype=jnp.float32)

    out = position_embedding(emb_table, x.shape[0], x.shape[1])
    out = jax.block_until_ready(out)

    # Pure-JAX reference: table[arange(L)] broadcast over batch.
    ref = jnp.broadcast_to(emb_table[:seq_len], (batch, seq_len, d_model))
    assert out.shape == (batch, seq_len, d_model)
    assert out.dtype == jnp.float32
    assert jnp.allclose(out, ref)

    print("KERNEL_OK")
</pallas_src>

<mosaic_0001>
module attributes {stable_mosaic.version = 11 : i64} {
  func.func @_pos_embed_kernel(%arg0: i32, %arg1: i32, %arg2: memref<8x128xf32, #tpu.memory_space<vmem>>, %arg3: memref<2x8x128xf32, #tpu.memory_space<vmem>>) attributes {dimension_semantics = [#tpu.dimension_semantics<parallel>, #tpu.dimension_semantics<parallel>], iteration_bounds = array<i64: 1, 1>, scalar_prefetch = 0 : i64, scratch_operands = 0 : i64, tpu.core_type = #tpu.core_type<tc>, window_params = [{transform_indices = @transform_0, window_bounds = array<i64: 8, 128>}, {transform_indices = @transform_1, window_bounds = array<i64: 2, 8, 128>}]} {
    %c0 = arith.constant 0 : index
    %c0_0 = arith.constant 0 : index
    %0 = vector.load %arg2[%c0, %c0_0] : memref<8x128xf32, #tpu.memory_space<vmem>>, vector<8x128xf32>
    %1 = vector.shape_cast %0 : vector<8x128xf32> to vector<1x8x128xf32>
    %2 = vector.shape_cast %1 : vector<1x8x128xf32> to vector<1x8x128xf32>
    %3 = vector.broadcast %2 : vector<1x8x128xf32> to vector<2x8x128xf32>
    %c0_1 = arith.constant 0 : index
    %c0_2 = arith.constant 0 : index
    %c0_3 = arith.constant 0 : index
    %4 = vector.load %arg3[%c0_1, %c0_2, %c0_3] : memref<2x8x128xf32, #tpu.memory_space<vmem>>, vector<2x8x128xf32>
    tpu.vector_store %arg3[%c0_1, %c0_2, %c0_3], %3 {strides = array<i32>} : memref<2x8x128xf32, #tpu.memory_space<vmem>>, vector<2x8x128xf32>,
    return
  }
  func.func @transform_0(%arg0: i32, %arg1: i32) -> (i32, i32) {
    %c0_i32 = arith.constant 0 : i32
    %c0_i32_0 = arith.constant 0 : i32
    return %arg0, %c0_i32 : i32, i32
  }
  func.func @transform_1(%arg0: i32, %arg1: i32) -> (i32, i32, i32) {
    %c0_i32 = arith.constant 0 : i32
    %c0_i32_0 = arith.constant 0 : i32
    return %arg1, %arg0, %c0_i32 : i32, i32, i32
  }
}

</mosaic_0001>

<bundles_post_ra>
// kernel: tpu_custom_call.1
= control target key start
LH: loop header
LB: loop body
LE: loop exit
PB: predicated region body
PF: predicated region fallthrough
CT: control target
= control target key end

     0   :  { %6 = vsyncpa [#allocation3], 0  ;;  %s121_s0 = inlined_call_operand.hbm [shape: f32[512,128], index: 0, kind: input, shape index: {}]   ;;  %s122_s1 = inlined_call_operand.hbm [shape: f32[2,8,128], index: 1, kind: output, shape index: {}]  }
   0x1   :  { %7 = vsyncpa [#allocation4], 0  ;;  %s13_s8 = sshll.u32 %s121_s0, 4  ;;  %s101_s9 = smov [#allocation2]   ;;  %s14_s8 = int_to_ptr.hbm [resolvable:$true] %s13_s8 }
   0x2   :  { %s15_s10 = sshll.u32 %s101_s9, 4  ;;  %s16_s10 = int_to_ptr.vmem [resolvable:$true] %s15_s10 }
   0x3   :  { %18 = dma.hbm_to_vmem [thread:$0]  %s14_s8, 128, %s16_s10, [#allocation3]  }
   0x4   :  { %97 = dma.done.wait [#allocation3], 128  }
   0x5   :  { %98 = vsyncadd [#allocation3], 4294967168  ;;  %s102_s11 = smov [#allocation5]   ;;  %s32_s15 = sshll.u32 %s122_s1, 4  ;;  %v23_v0 = vld [vmem:[#allocation2] sm:$0xff]  ;;  %s33_s15 = int_to_ptr.hbm [resolvable:$true] %s32_s15 }
   0x6   :  { %s30_s12 = sshll.u32 %s102_s11, 4  ;;  %24 = vst [vmem:[#allocation5] sm:$0xff] %v23_v0  ;;  %s103_s16 = smov 128   ;;  %s31_s12 = int_to_ptr.vmem [resolvable:$true] %s30_s12 }
   0x7   :  { %25 = vst [vmem:[#allocation5 + $0x8] sm:$0xff] %v23_v0  ;;  %s104_s0 = smov 8  }
   0x8   :  { %38 = dma.vmem_to_hbm [thread:$0]  %s31_s12, 256, %s33_s15, [#allocation4], %s103_s16, %s103_s16, %s104_s0  }
   0x9   :  { %99 = dma.done.wait [#allocation4], 256  }
   0xa   :  { %100 = vsyncadd [#allocation4], 4294967040 }
   0xb   :  { %43 = vsyncpa [#allocation3], 1 }
   0xc   :  { %44 = vsyncpa [#allocation4], 1 }

</bundles_post_ra>
